<compile_context>
chip_gen: v6e
topology: v6e:2x2x1
jax: 0.10.0
libtpu: 0.0.40
codegen_flags: <defaults>
</compile_context>

<pallas_src>
import functools

import jax
import jax.numpy as jnp
import numpy as np
from jax.experimental import pallas as pl
from jax.experimental.pallas import tpu as pltpu

LN_EPS = 1e-5  # torch.nn.LayerNorm default


def _layernorm(x, gamma, beta):
    mu = jnp.mean(x, axis=-1, keepdims=True)
    var = jnp.mean((x - mu) ** 2, axis=-1, keepdims=True)
    return (x - mu) * jax.lax.rsqrt(var + LN_EPS) * gamma + beta


def _gelu_exact(x):
    # torch.nn.GELU() default = exact erf-based GELU
    return 0.5 * x * (1.0 + jax.lax.erf(x * (1.0 / np.sqrt(2.0)).astype(x.dtype)))


def decoder_block_kernel(x_ref,
                         wq_ref, bq_ref, wk_ref, bk_ref, wv_ref, bv_ref,
                         wo_ref, bo_ref,
                         g1_ref, be1_ref,
                         w1_ref, b1_ref, w2_ref, b2_ref,
                         g2_ref, be2_ref,
                         out_ref, *, n_heads, head_dim):
    x = x_ref[0]                              # (L, d_model)
    L, d_model = x.shape

    # Fused QKV: block-diagonal (d_model, d_model) weights -> one wide matmul
    # each.  1/sqrt(head_dim) is already folded into wq/bq on the host.
    q = jnp.dot(x, wq_ref[...], preferred_element_type=jnp.float32) + bq_ref[...]
    k = jnp.dot(x, wk_ref[...], preferred_element_type=jnp.float32) + bk_ref[...]
    v = jnp.dot(x, wv_ref[...], preferred_element_type=jnp.float32) + bv_ref[...]

    rows = jax.lax.broadcasted_iota(jnp.int32, (L, L), 0)
    cols = jax.lax.broadcasted_iota(jnp.int32, (L, L), 1)
    causal = rows >= cols

    wo = wo_ref[...]                          # (d_model, d_model), y = o @ wo
    attn = jnp.zeros((L, d_model), jnp.float32)

    # Static unroll over heads is fine at n_heads=4; for large head counts this
    # would move to a grid axis to bound vreg live ranges.
    for h in range(n_heads):
        lo, hi = h * head_dim, (h + 1) * head_dim
        qh = q[:, lo:hi]
        kh = k[:, lo:hi]
        vh = v[:, lo:hi]

        s = jax.lax.dot_general(qh, kh, (((1,), (1,)), ((), ())),
                                preferred_element_type=jnp.float32)
        # single-pass causal mask (large finite negative; exp underflows to 0)
        s = jnp.where(causal, s, -1e30)
        m = jnp.max(s, axis=-1, keepdims=True)
        e = jnp.exp(s - m)
        p = e * pl.reciprocal(jnp.sum(e, axis=-1, keepdims=True), approx=True)

        oh = jnp.dot(p, vh, preferred_element_type=jnp.float32)     # (L, head_dim)
        # fold the Wo output projection per head (sublane-aligned static slice):
        # concat_h(o_h) @ Wo == sum_h o_h @ Wo[h*hd:(h+1)*hd, :]
        attn = attn + jnp.dot(oh, wo[lo:hi, :],
                              preferred_element_type=jnp.float32)

    attn = attn + bo_ref[...]

    # residual + LayerNorm 1
    x1 = _layernorm(x + attn, g1_ref[...], be1_ref[...])

    # FeedForward: Linear -> GELU -> Dropout -> Linear
    # TODO(synk): Dropout(0.2) is eval-mode identity here; training-mode
    # stochastic masking is not implemented.
    h1 = _gelu_exact(jnp.dot(x1, w1_ref[...], preferred_element_type=jnp.float32)
                     + b1_ref[...])
    ff = jnp.dot(h1, w2_ref[...], preferred_element_type=jnp.float32) + b2_ref[...]

    # residual + LayerNorm 2
    out_ref[0] = _layernorm(x1 + ff, g2_ref[...], be2_ref[...])


def decoder_block(x, params, n_heads):
    bs, L, d_model = x.shape
    head_dim = d_model // n_heads
    scale = 1.0 / np.sqrt(head_dim)

    # Host-side, tiny, one-time: block-diagonal fused-QKV weights and tiled
    # biases (the same per-head Linear repeated on the diagonal), with the
    # attention scale folded into the Q projection.
    eye = jnp.eye(n_heads, dtype=jnp.float32)
    wq_bd = jnp.kron(eye, params["wq_t"]) * scale     # (d_model, d_model)
    wk_bd = jnp.kron(eye, params["wk_t"])
    wv_bd = jnp.kron(eye, params["wv_t"])
    bq_f = jnp.tile(params["bq"], (1, n_heads)) * scale   # (1, d_model)
    bk_f = jnp.tile(params["bk"], (1, n_heads))
    bv_f = jnp.tile(params["bv"], (1, n_heads))

    args = (x,
            wq_bd, bq_f, wk_bd, bk_f, wv_bd, bv_f,
            params["wo_t"], params["bo"],
            params["ln1_g"], params["ln1_b"],
            params["w1_t"], params["b1"], params["w2_t"], params["b2"],
            params["ln2_g"], params["ln2_b"])

    def full_spec(a):
        return pl.BlockSpec(a.shape, lambda b: (0,) * a.ndim)

    in_specs = [pl.BlockSpec((1, L, d_model), lambda b: (b, 0, 0))] \
        + [full_spec(a) for a in args[1:]]

    # Explicit VMEM budget sized from the actual operands (weights are
    # double-buffered by default), with generous headroom; bounded well below
    # the physical limit of any current chip.
    total_bytes = sum(int(np.prod(a.shape)) * a.dtype.itemsize for a in args)
    vmem_limit = int(min(max(4 * total_bytes + (8 << 20), 16 << 20), 100 << 20))

    kernel = functools.partial(decoder_block_kernel,
                               n_heads=n_heads, head_dim=head_dim)
    return pl.pallas_call(
        kernel,
        out_shape=jax.ShapeDtypeStruct((bs, L, d_model), jnp.float32),
        grid=(bs,),
        in_specs=in_specs,
        out_specs=pl.BlockSpec((1, L, d_model), lambda b: (b, 0, 0)),
        compiler_params=pltpu.CompilerParams(
            dimension_semantics=("parallel",),
            vmem_limit_bytes=vmem_limit),
    )(*args)


def init_params(key, d_model, dff, n_heads):
    head_dim = d_model // n_heads
    ks = jax.random.split(key, 12)

    def lin(kw, kb, fan_in, fan_out):
        bound = 1.0 / np.sqrt(fan_in)
        # stored transposed: (in_features, out_features), so y = x @ w_t + b
        w_t = jax.random.uniform(kw, (fan_in, fan_out), jnp.float32, -bound, bound)
        b = jax.random.uniform(kb, (1, fan_out), jnp.float32, -bound, bound)
        return w_t, b

    wq_t, bq = lin(ks[0], ks[1], head_dim, head_dim)
    wk_t, bk = lin(ks[2], ks[3], head_dim, head_dim)
    wv_t, bv = lin(ks[4], ks[5], head_dim, head_dim)
    wo_t, bo = lin(ks[6], ks[7], d_model, d_model)
    w1_t, b1 = lin(ks[8], ks[9], d_model, dff)
    w2_t, b2 = lin(ks[10], ks[11], dff, d_model)
    return dict(
        wq_t=wq_t, bq=bq, wk_t=wk_t, bk=bk, wv_t=wv_t, bv=bv,
        wo_t=wo_t, bo=bo,
        ln1_g=jnp.ones((1, d_model), jnp.float32),
        ln1_b=jnp.zeros((1, d_model), jnp.float32),
        w1_t=w1_t, b1=b1, w2_t=w2_t, b2=b2,
        ln2_g=jnp.ones((1, d_model), jnp.float32),
        ln2_b=jnp.zeros((1, d_model), jnp.float32),
    )


def ref_decoder_block(x, p, n_heads):
    """Pure-JAX mirror of the PyTorch forward (eval mode)."""
    bs, L, d = x.shape
    hd = d // n_heads
    xh = x.reshape(bs, L, n_heads, hd).transpose(0, 2, 1, 3)
    q = xh @ p["wq_t"] + p["bq"][0]
    k = xh @ p["wk_t"] + p["bk"][0]
    v = xh @ p["wv_t"] + p["bv"][0]
    s = jnp.einsum("bhqd,bhkd->bhqk", q, k) / hd ** 0.5
    s = jnp.tril(s)
    s = jnp.where(s == 0.0, -jnp.inf, s)
    a = jax.nn.softmax(s, axis=-1)
    o = jnp.einsum("bhqk,bhkd->bhqd", a, v).transpose(0, 2, 1, 3).reshape(bs, L, d)
    o = o @ p["wo_t"] + p["bo"][0]
    x1 = _layernorm(x + o, p["ln1_g"][0], p["ln1_b"][0])
    h1 = _gelu_exact(x1 @ p["w1_t"] + p["b1"][0])
    ff = h1 @ p["w2_t"] + p["b2"][0]
    return _layernorm(x1 + ff, p["ln2_g"][0], p["ln2_b"][0])


if __name__ == "__main__":
    bs, L, d_model, n_heads, dff = 2, 8, 32, 4, 64
    key = jax.random.PRNGKey(0)
    kx, kp = jax.random.split(key)
    x = jax.random.normal(kx, (bs, L, d_model), jnp.float32)
    params = init_params(kp, d_model, dff, n_heads)

    out = jax.block_until_ready(decoder_block(x, params, n_heads))

    ref = ref_decoder_block(x, params, n_heads)
    # tolerance accounts for the approx (EUP) reciprocal in the softmax
    np.testing.assert_allclose(np.asarray(out), np.asarray(ref),
                               rtol=5e-3, atol=5e-3)
    print("KERNEL_OK")
</pallas_src>

<mosaic_0001>
module attributes {stable_mosaic.version = 11 : i64} {
  func.func @decoder_block_kernel(%arg0: i32, %arg1: memref<1x8x32xf32, #tpu.memory_space<vmem>>, %arg2: memref<32x32xf32, #tpu.memory_space<vmem>>, %arg3: memref<1x32xf32, #tpu.memory_space<vmem>>, %arg4: memref<32x32xf32, #tpu.memory_space<vmem>>, %arg5: memref<1x32xf32, #tpu.memory_space<vmem>>, %arg6: memref<32x32xf32, #tpu.memory_space<vmem>>, %arg7: memref<1x32xf32, #tpu.memory_space<vmem>>, %arg8: memref<32x32xf32, #tpu.memory_space<vmem>>, %arg9: memref<1x32xf32, #tpu.memory_space<vmem>>, %arg10: memref<1x32xf32, #tpu.memory_space<vmem>>, %arg11: memref<1x32xf32, #tpu.memory_space<vmem>>, %arg12: memref<32x64xf32, #tpu.memory_space<vmem>>, %arg13: memref<1x64xf32, #tpu.memory_space<vmem>>, %arg14: memref<64x32xf32, #tpu.memory_space<vmem>>, %arg15: memref<1x32xf32, #tpu.memory_space<vmem>>, %arg16: memref<1x32xf32, #tpu.memory_space<vmem>>, %arg17: memref<1x32xf32, #tpu.memory_space<vmem>>, %arg18: memref<1x8x32xf32, #tpu.memory_space<vmem>>) attributes {dimension_semantics = [#tpu.dimension_semantics<parallel>], iteration_bounds = array<i64: 2>, scalar_prefetch = 0 : i64, scratch_operands = 0 : i64, tpu.core_type = #tpu.core_type<tc>, window_params = [{transform_indices = @transform_0, window_bounds = array<i64: 1, 8, 32>}, {pipeline_mode = #tpu.pipeline_mode<synchronous>, transform_indices = @transform_1, window_bounds = array<i64: 32, 32>}, {pipeline_mode = #tpu.pipeline_mode<synchronous>, transform_indices = @transform_2, window_bounds = array<i64: 1, 32>}, {pipeline_mode = #tpu.pipeline_mode<synchronous>, transform_indices = @transform_3, window_bounds = array<i64: 32, 32>}, {pipeline_mode = #tpu.pipeline_mode<synchronous>, transform_indices = @transform_4, window_bounds = array<i64: 1, 32>}, {pipeline_mode = #tpu.pipeline_mode<synchronous>, transform_indices = @transform_5, window_bounds = array<i64: 32, 32>}, {pipeline_mode = #tpu.pipeline_mode<synchronous>, transform_indices = @transform_6, window_bounds = array<i64: 1, 32>}, {pipeline_mode = #tpu.pipeline_mode<synchronous>, transform_indices = @transform_7, window_bounds = array<i64: 32, 32>}, {pipeline_mode = #tpu.pipeline_mode<synchronous>, transform_indices = @transform_8, window_bounds = array<i64: 1, 32>}, {pipeline_mode = #tpu.pipeline_mode<synchronous>, transform_indices = @transform_9, window_bounds = array<i64: 1, 32>}, {pipeline_mode = #tpu.pipeline_mode<synchronous>, transform_indices = @transform_10, window_bounds = array<i64: 1, 32>}, {pipeline_mode = #tpu.pipeline_mode<synchronous>, transform_indices = @transform_11, window_bounds = array<i64: 32, 64>}, {pipeline_mode = #tpu.pipeline_mode<synchronous>, transform_indices = @transform_12, window_bounds = array<i64: 1, 64>}, {pipeline_mode = #tpu.pipeline_mode<synchronous>, transform_indices = @transform_13, window_bounds = array<i64: 64, 32>}, {pipeline_mode = #tpu.pipeline_mode<synchronous>, transform_indices = @transform_14, window_bounds = array<i64: 1, 32>}, {pipeline_mode = #tpu.pipeline_mode<synchronous>, transform_indices = @transform_15, window_bounds = array<i64: 1, 32>}, {pipeline_mode = #tpu.pipeline_mode<synchronous>, transform_indices = @transform_16, window_bounds = array<i64: 1, 32>}, {transform_indices = @transform_17, window_bounds = array<i64: 1, 8, 32>}]} {
    %c0 = arith.constant 0 : index
    %c0_0 = arith.constant 0 : index
    %c0_1 = arith.constant 0 : index
    %0 = vector.load %arg1[%c0, %c0_0, %c0_1] : memref<1x8x32xf32, #tpu.memory_space<vmem>>, vector<1x8x32xf32>
    %1 = vector.shape_cast %0 : vector<1x8x32xf32> to vector<8x32xf32>
    %c0_2 = arith.constant 0 : index
    %c0_3 = arith.constant 0 : index
    %2 = vector.load %arg2[%c0_2, %c0_3] : memref<32x32xf32, #tpu.memory_space<vmem>>, vector<32x32xf32>
    %cst = arith.constant dense<0.000000e+00> : vector<8x32xf32>
    %3 = tpu.matmul %1, %2, %cst {dimension_numbers = #tpu.dot_dimension_numbers<[1], [0], [0], [1], [0, 0, 1, 1], [], []>} : vector<8x32xf32>, vector<32x32xf32>, vector<8x32xf32> -> vector<8x32xf32>
    %c0_4 = arith.constant 0 : index
    %c0_5 = arith.constant 0 : index
    %4 = vector.load %arg3[%c0_4, %c0_5] : memref<1x32xf32, #tpu.memory_space<vmem>>, vector<1x32xf32>
    %5 = vector.broadcast %4 : vector<1x32xf32> to vector<8x32xf32>
    %6 = arith.addf %3, %5 : vector<8x32xf32>
    %c0_6 = arith.constant 0 : index
    %c0_7 = arith.constant 0 : index
    %7 = vector.load %arg4[%c0_6, %c0_7] : memref<32x32xf32, #tpu.memory_space<vmem>>, vector<32x32xf32>
    %cst_8 = arith.constant dense<0.000000e+00> : vector<8x32xf32>
    %8 = tpu.matmul %1, %7, %cst_8 {dimension_numbers = #tpu.dot_dimension_numbers<[1], [0], [0], [1], [0, 0, 1, 1], [], []>} : vector<8x32xf32>, vector<32x32xf32>, vector<8x32xf32> -> vector<8x32xf32>
    %c0_9 = arith.constant 0 : index
    %c0_10 = arith.constant 0 : index
    %9 = vector.load %arg5[%c0_9, %c0_10] : memref<1x32xf32, #tpu.memory_space<vmem>>, vector<1x32xf32>
    %10 = vector.broadcast %9 : vector<1x32xf32> to vector<8x32xf32>
    %11 = arith.addf %8, %10 : vector<8x32xf32>
    %c0_11 = arith.constant 0 : index
    %c0_12 = arith.constant 0 : index
    %12 = vector.load %arg6[%c0_11, %c0_12] : memref<32x32xf32, #tpu.memory_space<vmem>>, vector<32x32xf32>
    %cst_13 = arith.constant dense<0.000000e+00> : vector<8x32xf32>
    %13 = tpu.matmul %1, %12, %cst_13 {dimension_numbers = #tpu.dot_dimension_numbers<[1], [0], [0], [1], [0, 0, 1, 1], [], []>} : vector<8x32xf32>, vector<32x32xf32>, vector<8x32xf32> -> vector<8x32xf32>
    %c0_14 = arith.constant 0 : index
    %c0_15 = arith.constant 0 : index
    %14 = vector.load %arg7[%c0_14, %c0_15] : memref<1x32xf32, #tpu.memory_space<vmem>>, vector<1x32xf32>
    %15 = vector.broadcast %14 : vector<1x32xf32> to vector<8x32xf32>
    %16 = arith.addf %13, %15 : vector<8x32xf32>
    %17 = tpu.iota {dimensions = array<i32: 0>} : vector<8x8xi32>
    %18 = tpu.iota {dimensions = array<i32: 1>} : vector<8x8xi32>
    %19 = arith.cmpi sge, %17, %18 : vector<8x8xi32>
    %c0_16 = arith.constant 0 : index
    %c0_17 = arith.constant 0 : index
    %20 = vector.load %arg8[%c0_16, %c0_17] : memref<32x32xf32, #tpu.memory_space<vmem>>, vector<32x32xf32>
    %cst_18 = arith.constant 0.000000e+00 : f32
    %21 = vector.broadcast %cst_18 : f32 to vector<8x32xf32>
    %22 = vector.extract_strided_slice %6 {offsets = [0, 0], sizes = [8, 8], strides = [1, 1]} : vector<8x32xf32> to vector<8x8xf32>
    %23 = vector.extract_strided_slice %11 {offsets = [0, 0], sizes = [8, 8], strides = [1, 1]} : vector<8x32xf32> to vector<8x8xf32>
    %24 = vector.extract_strided_slice %16 {offsets = [0, 0], sizes = [8, 8], strides = [1, 1]} : vector<8x32xf32> to vector<8x8xf32>
    %cst_19 = arith.constant dense<0.000000e+00> : vector<8x8xf32>
    %25 = tpu.matmul %22, %23, %cst_19 {dimension_numbers = #tpu.dot_dimension_numbers<[1], [1], [0], [0], [0, 0, 1, 0], [], []>} : vector<8x8xf32>, vector<8x8xf32>, vector<8x8xf32> -> vector<8x8xf32>
    %cst_20 = arith.constant -1.000000e+30 : f32
    %26 = vector.broadcast %cst_20 : f32 to vector<8x8xf32>
    %27 = arith.select %19, %25, %26 : vector<8x8xi1>, vector<8x8xf32>
    %cst_21 = arith.constant dense<0xFF800000> : vector<8xf32>
    %28 = vector.multi_reduction <maximumf>, %27, %cst_21 [1] : vector<8x8xf32> to vector<8xf32>
    %29 = vector.shape_cast %28 : vector<8xf32> to vector<8x1xf32>
    %30 = vector.broadcast %29 : vector<8x1xf32> to vector<8x8xf32>
    %31 = arith.subf %27, %30 : vector<8x8xf32>
    %32 = math.exp %31 : vector<8x8xf32>
    %cst_22 = arith.constant dense<0.000000e+00> : vector<8xf32>
    %33 = vector.multi_reduction <add>, %32, %cst_22 [1] : vector<8x8xf32> to vector<8xf32>
    %34 = vector.shape_cast %33 : vector<8xf32> to vector<8x1xf32>
    %35 = tpu.reciprocal %34 {approx = true} : vector<8x1xf32> -> vector<8x1xf32>
    %36 = vector.broadcast %35 : vector<8x1xf32> to vector<8x8xf32>
    %37 = arith.mulf %32, %36 : vector<8x8xf32>
    %cst_23 = arith.constant dense<0.000000e+00> : vector<8x8xf32>
    %38 = tpu.matmul %37, %24, %cst_23 {dimension_numbers = #tpu.dot_dimension_numbers<[1], [0], [0], [1], [0, 0, 1, 1], [], []>} : vector<8x8xf32>, vector<8x8xf32>, vector<8x8xf32> -> vector<8x8xf32>
    %39 = vector.extract_strided_slice %20 {offsets = [0, 0], sizes = [8, 32], strides = [1, 1]} : vector<32x32xf32> to vector<8x32xf32>
    %cst_24 = arith.constant dense<0.000000e+00> : vector<8x32xf32>
    %40 = tpu.matmul %38, %39, %cst_24 {dimension_numbers = #tpu.dot_dimension_numbers<[1], [0], [0], [1], [0, 0, 1, 1], [], []>} : vector<8x8xf32>, vector<8x32xf32>, vector<8x32xf32> -> vector<8x32xf32>
    %41 = arith.addf %21, %40 : vector<8x32xf32>
    %42 = vector.extract_strided_slice %6 {offsets = [0, 8], sizes = [8, 8], strides = [1, 1]} : vector<8x32xf32> to vector<8x8xf32>
    %43 = vector.extract_strided_slice %11 {offsets = [0, 8], sizes = [8, 8], strides = [1, 1]} : vector<8x32xf32> to vector<8x8xf32>
    %44 = vector.extract_strided_slice %16 {offsets = [0, 8], sizes = [8, 8], strides = [1, 1]} : vector<8x32xf32> to vector<8x8xf32>
    %cst_25 = arith.constant dense<0.000000e+00> : vector<8x8xf32>
    %45 = tpu.matmul %42, %43, %cst_25 {dimension_numbers = #tpu.dot_dimension_numbers<[1], [1], [0], [0], [0, 0, 1, 0], [], []>} : vector<8x8xf32>, vector<8x8xf32>, vector<8x8xf32> -> vector<8x8xf32>
    %cst_26 = arith.constant -1.000000e+30 : f32
    %46 = vector.broadcast %cst_26 : f32 to vector<8x8xf32>
    %47 = arith.select %19, %45, %46 : vector<8x8xi1>, vector<8x8xf32>
    %cst_27 = arith.constant dense<0xFF800000> : vector<8xf32>
    %48 = vector.multi_reduction <maximumf>, %47, %cst_27 [1] : vector<8x8xf32> to vector<8xf32>
    %49 = vector.shape_cast %48 : vector<8xf32> to vector<8x1xf32>
    %50 = vector.broadcast %49 : vector<8x1xf32> to vector<8x8xf32>
    %51 = arith.subf %47, %50 : vector<8x8xf32>
    %52 = math.exp %51 : vector<8x8xf32>
    %cst_28 = arith.constant dense<0.000000e+00> : vector<8xf32>
    %53 = vector.multi_reduction <add>, %52, %cst_28 [1] : vector<8x8xf32> to vector<8xf32>
    %54 = vector.shape_cast %53 : vector<8xf32> to vector<8x1xf32>
    %55 = tpu.reciprocal %54 {approx = true} : vector<8x1xf32> -> vector<8x1xf32>
    %56 = vector.broadcast %55 : vector<8x1xf32> to vector<8x8xf32>
    %57 = arith.mulf %52, %56 : vector<8x8xf32>
    %cst_29 = arith.constant dense<0.000000e+00> : vector<8x8xf32>
    %58 = tpu.matmul %57, %44, %cst_29 {dimension_numbers = #tpu.dot_dimension_numbers<[1], [0], [0], [1], [0, 0, 1, 1], [], []>} : vector<8x8xf32>, vector<8x8xf32>, vector<8x8xf32> -> vector<8x8xf32>
    %59 = vector.extract_strided_slice %20 {offsets = [8, 0], sizes = [8, 32], strides = [1, 1]} : vector<32x32xf32> to vector<8x32xf32>
    %cst_30 = arith.constant dense<0.000000e+00> : vector<8x32xf32>
    %60 = tpu.matmul %58, %59, %cst_30 {dimension_numbers = #tpu.dot_dimension_numbers<[1], [0], [0], [1], [0, 0, 1, 1], [], []>} : vector<8x8xf32>, vector<8x32xf32>, vector<8x32xf32> -> vector<8x32xf32>
    %61 = arith.addf %41, %60 : vector<8x32xf32>
    %62 = vector.extract_strided_slice %6 {offsets = [0, 16], sizes = [8, 8], strides = [1, 1]} : vector<8x32xf32> to vector<8x8xf32>
    %63 = vector.extract_strided_slice %11 {offsets = [0, 16], sizes = [8, 8], strides = [1, 1]} : vector<8x32xf32> to vector<8x8xf32>
    %64 = vector.extract_strided_slice %16 {offsets = [0, 16], sizes = [8, 8], strides = [1, 1]} : vector<8x32xf32> to vector<8x8xf32>
    %cst_31 = arith.constant dense<0.000000e+00> : vector<8x8xf32>
    %65 = tpu.matmul %62, %63, %cst_31 {dimension_numbers = #tpu.dot_dimension_numbers<[1], [1], [0], [0], [0, 0, 1, 0], [], []>} : vector<8x8xf32>, vector<8x8xf32>, vector<8x8xf32> -> vector<8x8xf32>
    %cst_32 = arith.constant -1.000000e+30 : f32
    %66 = vector.broadcast %cst_32 : f32 to vector<8x8xf32>
    %67 = arith.select %19, %65, %66 : vector<8x8xi1>, vector<8x8xf32>
    %cst_33 = arith.constant dense<0xFF800000> : vector<8xf32>
    %68 = vector.multi_reduction <maximumf>, %67, %cst_33 [1] : vector<8x8xf32> to vector<8xf32>
    %69 = vector.shape_cast %68 : vector<8xf32> to vector<8x1xf32>
    %70 = vector.broadcast %69 : vector<8x1xf32> to vector<8x8xf32>
    %71 = arith.subf %67, %70 : vector<8x8xf32>
    %72 = math.exp %71 : vector<8x8xf32>
    %cst_34 = arith.constant dense<0.000000e+00> : vector<8xf32>
    %73 = vector.multi_reduction <add>, %72, %cst_34 [1] : vector<8x8xf32> to vector<8xf32>
    %74 = vector.shape_cast %73 : vector<8xf32> to vector<8x1xf32>
    %75 = tpu.reciprocal %74 {approx = true} : vector<8x1xf32> -> vector<8x1xf32>
    %76 = vector.broadcast %75 : vector<8x1xf32> to vector<8x8xf32>
    %77 = arith.mulf %72, %76 : vector<8x8xf32>
    %cst_35 = arith.constant dense<0.000000e+00> : vector<8x8xf32>
    %78 = tpu.matmul %77, %64, %cst_35 {dimension_numbers = #tpu.dot_dimension_numbers<[1], [0], [0], [1], [0, 0, 1, 1], [], []>} : vector<8x8xf32>, vector<8x8xf32>, vector<8x8xf32> -> vector<8x8xf32>
    %79 = vector.extract_strided_slice %20 {offsets = [16, 0], sizes = [8, 32], strides = [1, 1]} : vector<32x32xf32> to vector<8x32xf32>
    %cst_36 = arith.constant dense<0.000000e+00> : vector<8x32xf32>
    %80 = tpu.matmul %78, %79, %cst_36 {dimension_numbers = #tpu.dot_dimension_numbers<[1], [0], [0], [1], [0, 0, 1, 1], [], []>} : vector<8x8xf32>, vector<8x32xf32>, vector<8x32xf32> -> vector<8x32xf32>
    %81 = arith.addf %61, %80 : vector<8x32xf32>
    %82 = vector.extract_strided_slice %6 {offsets = [0, 24], sizes = [8, 8], strides = [1, 1]} : vector<8x32xf32> to vector<8x8xf32>
    %83 = vector.extract_strided_slice %11 {offsets = [0, 24], sizes = [8, 8], strides = [1, 1]} : vector<8x32xf32> to vector<8x8xf32>
    %84 = vector.extract_strided_slice %16 {offsets = [0, 24], sizes = [8, 8], strides = [1, 1]} : vector<8x32xf32> to vector<8x8xf32>
    %cst_37 = arith.constant dense<0.000000e+00> : vector<8x8xf32>
    %85 = tpu.matmul %82, %83, %cst_37 {dimension_numbers = #tpu.dot_dimension_numbers<[1], [1], [0], [0], [0, 0, 1, 0], [], []>} : vector<8x8xf32>, vector<8x8xf32>, vector<8x8xf32> -> vector<8x8xf32>
    %cst_38 = arith.constant -1.000000e+30 : f32
    %86 = vector.broadcast %cst_38 : f32 to vector<8x8xf32>
    %87 = arith.select %19, %85, %86 : vector<8x8xi1>, vector<8x8xf32>
    %cst_39 = arith.constant dense<0xFF800000> : vector<8xf32>
    %88 = vector.multi_reduction <maximumf>, %87, %cst_39 [1] : vector<8x8xf32> to vector<8xf32>
    %89 = vector.shape_cast %88 : vector<8xf32> to vector<8x1xf32>
    %90 = vector.broadcast %89 : vector<8x1xf32> to vector<8x8xf32>
    %91 = arith.subf %87, %90 : vector<8x8xf32>
    %92 = math.exp %91 : vector<8x8xf32>
    %cst_40 = arith.constant dense<0.000000e+00> : vector<8xf32>
    %93 = vector.multi_reduction <add>, %92, %cst_40 [1] : vector<8x8xf32> to vector<8xf32>
    %94 = vector.shape_cast %93 : vector<8xf32> to vector<8x1xf32>
    %95 = tpu.reciprocal %94 {approx = true} : vector<8x1xf32> -> vector<8x1xf32>
    %96 = vector.broadcast %95 : vector<8x1xf32> to vector<8x8xf32>
    %97 = arith.mulf %92, %96 : vector<8x8xf32>
    %cst_41 = arith.constant dense<0.000000e+00> : vector<8x8xf32>
    %98 = tpu.matmul %97, %84, %cst_41 {dimension_numbers = #tpu.dot_dimension_numbers<[1], [0], [0], [1], [0, 0, 1, 1], [], []>} : vector<8x8xf32>, vector<8x8xf32>, vector<8x8xf32> -> vector<8x8xf32>
    %99 = vector.extract_strided_slice %20 {offsets = [24, 0], sizes = [8, 32], strides = [1, 1]} : vector<32x32xf32> to vector<8x32xf32>
    %cst_42 = arith.constant dense<0.000000e+00> : vector<8x32xf32>
    %100 = tpu.matmul %98, %99, %cst_42 {dimension_numbers = #tpu.dot_dimension_numbers<[1], [0], [0], [1], [0, 0, 1, 1], [], []>} : vector<8x8xf32>, vector<8x32xf32>, vector<8x32xf32> -> vector<8x32xf32>
    %101 = arith.addf %81, %100 : vector<8x32xf32>
    %c0_43 = arith.constant 0 : index
    %c0_44 = arith.constant 0 : index
    %102 = vector.load %arg9[%c0_43, %c0_44] : memref<1x32xf32, #tpu.memory_space<vmem>>, vector<1x32xf32>
    %103 = vector.broadcast %102 : vector<1x32xf32> to vector<8x32xf32>
    %104 = arith.addf %101, %103 : vector<8x32xf32>
    %105 = arith.addf %1, %104 : vector<8x32xf32>
    %c0_45 = arith.constant 0 : index
    %c0_46 = arith.constant 0 : index
    %106 = vector.load %arg10[%c0_45, %c0_46] : memref<1x32xf32, #tpu.memory_space<vmem>>, vector<1x32xf32>
    %c0_47 = arith.constant 0 : index
    %c0_48 = arith.constant 0 : index
    %107 = vector.load %arg11[%c0_47, %c0_48] : memref<1x32xf32, #tpu.memory_space<vmem>>, vector<1x32xf32>
    %cst_49 = arith.constant dense<0.000000e+00> : vector<8xf32>
    %108 = vector.multi_reduction <add>, %105, %cst_49 [1] : vector<8x32xf32> to vector<8xf32>
    %109 = vector.shape_cast %108 : vector<8xf32> to vector<8x1xf32>
    %cst_50 = arith.constant 3.200000e+01 : f32
    %110 = vector.broadcast %cst_50 : f32 to vector<8x1xf32>
    %111 = arith.divf %109, %110 : vector<8x1xf32>
    %112 = vector.broadcast %111 : vector<8x1xf32> to vector<8x32xf32>
    %113 = arith.subf %105, %112 : vector<8x32xf32>
    %114 = arith.mulf %113, %113 : vector<8x32xf32>
    %cst_51 = arith.constant dense<0.000000e+00> : vector<8xf32>
    %115 = vector.multi_reduction <add>, %114, %cst_51 [1] : vector<8x32xf32> to vector<8xf32>
    %116 = vector.shape_cast %115 : vector<8xf32> to vector<8x1xf32>
    %cst_52 = arith.constant 3.200000e+01 : f32
    %117 = vector.broadcast %cst_52 : f32 to vector<8x1xf32>
    %118 = arith.divf %116, %117 : vector<8x1xf32>
    %119 = vector.broadcast %111 : vector<8x1xf32> to vector<8x32xf32>
    %120 = arith.subf %105, %119 : vector<8x32xf32>
    %cst_53 = arith.constant 9.99999974E-6 : f32
    %121 = vector.broadcast %cst_53 : f32 to vector<8x1xf32>
    %122 = arith.addf %118, %121 : vector<8x1xf32>
    %123 = math.rsqrt %122 : vector<8x1xf32>
    %124 = vector.broadcast %123 : vector<8x1xf32> to vector<8x32xf32>
    %125 = arith.mulf %120, %124 : vector<8x32xf32>
    %126 = vector.broadcast %106 : vector<1x32xf32> to vector<8x32xf32>
    %127 = arith.mulf %125, %126 : vector<8x32xf32>
    %128 = vector.broadcast %107 : vector<1x32xf32> to vector<8x32xf32>
    %129 = arith.addf %127, %128 : vector<8x32xf32>
    %c0_54 = arith.constant 0 : index
    %c0_55 = arith.constant 0 : index
    %130 = vector.load %arg12[%c0_54, %c0_55] : memref<32x64xf32, #tpu.memory_space<vmem>>, vector<32x64xf32>
    %cst_56 = arith.constant dense<0.000000e+00> : vector<8x64xf32>
    %131 = tpu.matmul %129, %130, %cst_56 {dimension_numbers = #tpu.dot_dimension_numbers<[1], [0], [0], [1], [0, 0, 1, 1], [], []>} : vector<8x32xf32>, vector<32x64xf32>, vector<8x64xf32> -> vector<8x64xf32>
    %c0_57 = arith.constant 0 : index
    %c0_58 = arith.constant 0 : index
    %132 = vector.load %arg13[%c0_57, %c0_58] : memref<1x64xf32, #tpu.memory_space<vmem>>, vector<1x64xf32>
    %133 = vector.broadcast %132 : vector<1x64xf32> to vector<8x64xf32>
    %134 = arith.addf %131, %133 : vector<8x64xf32>
    %cst_59 = arith.constant 5.000000e-01 : f32
    %135 = vector.broadcast %cst_59 : f32 to vector<8x64xf32>
    %136 = arith.mulf %135, %134 : vector<8x64xf32>
    %cst_60 = arith.constant 0.707106769 : f32
    %137 = vector.broadcast %cst_60 : f32 to vector<8x64xf32>
    %138 = arith.mulf %134, %137 : vector<8x64xf32>
    %139 = math.erf %138 : vector<8x64xf32>
    %cst_61 = arith.constant 1.000000e+00 : f32
    %140 = vector.broadcast %cst_61 : f32 to vector<8x64xf32>
    %141 = arith.addf %140, %139 : vector<8x64xf32>
    %142 = arith.mulf %136, %141 : vector<8x64xf32>
    %c0_62 = arith.constant 0 : index
    %c0_63 = arith.constant 0 : index
    %143 = vector.load %arg14[%c0_62, %c0_63] : memref<64x32xf32, #tpu.memory_space<vmem>>, vector<64x32xf32>
    %cst_64 = arith.constant dense<0.000000e+00> : vector<8x32xf32>
    %144 = tpu.matmul %142, %143, %cst_64 {dimension_numbers = #tpu.dot_dimension_numbers<[1], [0], [0], [1], [0, 0, 1, 1], [], []>} : vector<8x64xf32>, vector<64x32xf32>, vector<8x32xf32> -> vector<8x32xf32>
    %c0_65 = arith.constant 0 : index
    %c0_66 = arith.constant 0 : index
    %145 = vector.load %arg15[%c0_65, %c0_66] : memref<1x32xf32, #tpu.memory_space<vmem>>, vector<1x32xf32>
    %146 = vector.broadcast %145 : vector<1x32xf32> to vector<8x32xf32>
    %147 = arith.addf %144, %146 : vector<8x32xf32>
    %148 = arith.addf %129, %147 : vector<8x32xf32>
    %c0_67 = arith.constant 0 : index
    %c0_68 = arith.constant 0 : index
    %149 = vector.load %arg16[%c0_67, %c0_68] : memref<1x32xf32, #tpu.memory_space<vmem>>, vector<1x32xf32>
    %c0_69 = arith.constant 0 : index
    %c0_70 = arith.constant 0 : index
    %150 = vector.load %arg17[%c0_69, %c0_70] : memref<1x32xf32, #tpu.memory_space<vmem>>, vector<1x32xf32>
    %cst_71 = arith.constant dense<0.000000e+00> : vector<8xf32>
    %151 = vector.multi_reduction <add>, %148, %cst_71 [1] : vector<8x32xf32> to vector<8xf32>
    %152 = vector.shape_cast %151 : vector<8xf32> to vector<8x1xf32>
    %cst_72 = arith.constant 3.200000e+01 : f32
    %153 = vector.broadcast %cst_72 : f32 to vector<8x1xf32>
    %154 = arith.divf %152, %153 : vector<8x1xf32>
    %155 = vector.broadcast %154 : vector<8x1xf32> to vector<8x32xf32>
    %156 = arith.subf %148, %155 : vector<8x32xf32>
    %157 = arith.mulf %156, %156 : vector<8x32xf32>
    %cst_73 = arith.constant dense<0.000000e+00> : vector<8xf32>
    %158 = vector.multi_reduction <add>, %157, %cst_73 [1] : vector<8x32xf32> to vector<8xf32>
    %159 = vector.shape_cast %158 : vector<8xf32> to vector<8x1xf32>
    %cst_74 = arith.constant 3.200000e+01 : f32
    %160 = vector.broadcast %cst_74 : f32 to vector<8x1xf32>
    %161 = arith.divf %159, %160 : vector<8x1xf32>
    %162 = vector.broadcast %154 : vector<8x1xf32> to vector<8x32xf32>
    %163 = arith.subf %148, %162 : vector<8x32xf32>
    %cst_75 = arith.constant 9.99999974E-6 : f32
    %164 = vector.broadcast %cst_75 : f32 to vector<8x1xf32>
    %165 = arith.addf %161, %164 : vector<8x1xf32>
    %166 = math.rsqrt %165 : vector<8x1xf32>
    %167 = vector.broadcast %166 : vector<8x1xf32> to vector<8x32xf32>
    %168 = arith.mulf %163, %167 : vector<8x32xf32>
    %169 = vector.broadcast %149 : vector<1x32xf32> to vector<8x32xf32>
    %170 = arith.mulf %168, %169 : vector<8x32xf32>
    %171 = vector.broadcast %150 : vector<1x32xf32> to vector<8x32xf32>
    %172 = arith.addf %170, %171 : vector<8x32xf32>
    %c0_76 = arith.constant 0 : index
    %c0_77 = arith.constant 0 : index
    %c0_78 = arith.constant 0 : index
    %173 = vector.load %arg18[%c0_76, %c0_77, %c0_78] : memref<1x8x32xf32, #tpu.memory_space<vmem>>, vector<1x8x32xf32>
    %174 = vector.shape_cast %173 : vector<1x8x32xf32> to vector<8x32xf32>
    %175 = vector.shape_cast %172 : vector<8x32xf32> to vector<1x8x32xf32>
    tpu.vector_store %arg18[%c0_76, %c0_77, %c0_78], %175 {strides = array<i32>} : memref<1x8x32xf32, #tpu.memory_space<vmem>>, vector<1x8x32xf32>,
    return
  }
  func.func @transform_0(%arg0: i32) -> (i32, i32, i32) {
    %c0_i32 = arith.constant 0 : i32
    %c0_i32_0 = arith.constant 0 : i32
    %c0_i32_1 = arith.constant 0 : i32
    return %arg0, %c0_i32, %c0_i32_0 : i32, i32, i32
  }
  func.func @transform_1(%arg0: i32) -> (i32, i32) {
    %c0_i32 = arith.constant 0 : i32
    %c0_i32_0 = arith.constant 0 : i32
    %c0_i32_1 = arith.constant 0 : i32
    return %c0_i32, %c0_i32_0 : i32, i32
  }
  func.func @transform_2(%arg0: i32) -> (i32, i32) {
    %c0_i32 = arith.constant 0 : i32
    %c0_i32_0 = arith.constant 0 : i32
    %c0_i32_1 = arith.constant 0 : i32
    return %c0_i32, %c0_i32_0 : i32, i32
  }
  func.func @transform_3(%arg0: i32) -> (i32, i32) {
    %c0_i32 = arith.constant 0 : i32
    %c0_i32_0 = arith.constant 0 : i32
    %c0_i32_1 = arith.constant 0 : i32
    return %c0_i32, %c0_i32_0 : i32, i32
  }
  func.func @transform_4(%arg0: i32) -> (i32, i32) {
    %c0_i32 = arith.constant 0 : i32
    %c0_i32_0 = arith.constant 0 : i32
    %c0_i32_1 = arith.constant 0 : i32
    return %c0_i32, %c0_i32_0 : i32, i32
  }
  func.func @transform_5(%arg0: i32) -> (i32, i32) {
    %c0_i32 = arith.constant 0 : i32
    %c0_i32_0 = arith.constant 0 : i32
    %c0_i32_1 = arith.constant 0 : i32
    return %c0_i32, %c0_i32_0 : i32, i32
  }
  func.func @transform_6(%arg0: i32) -> (i32, i32) {
    %c0_i32 = arith.constant 0 : i32
    %c0_i32_0 = arith.constant 0 : i32
    %c0_i32_1 = arith.constant 0 : i32
    return %c0_i32, %c0_i32_0 : i32, i32
  }
  func.func @transform_7(%arg0: i32) -> (i32, i32) {
    %c0_i32 = arith.constant 0 : i32
    %c0_i32_0 = arith.constant 0 : i32
    %c0_i32_1 = arith.constant 0 : i32
    return %c0_i32, %c0_i32_0 : i32, i32
  }
  func.func @transform_8(%arg0: i32) -> (i32, i32) {
    %c0_i32 = arith.constant 0 : i32
    %c0_i32_0 = arith.constant 0 : i32
    %c0_i32_1 = arith.constant 0 : i32
    return %c0_i32, %c0_i32_0 : i32, i32
  }
  func.func @transform_9(%arg0: i32) -> (i32, i32) {
    %c0_i32 = arith.constant 0 : i32
    %c0_i32_0 = arith.constant 0 : i32
    %c0_i32_1 = arith.constant 0 : i32
    return %c0_i32, %c0_i32_0 : i32, i32
  }
  func.func @transform_10(%arg0: i32) -> (i32, i32) {
    %c0_i32 = arith.constant 0 : i32
    %c0_i32_0 = arith.constant 0 : i32
    %c0_i32_1 = arith.constant 0 : i32
    return %c0_i32, %c0_i32_0 : i32, i32
  }
  func.func @transform_11(%arg0: i32) -> (i32, i32) {
    %c0_i32 = arith.constant 0 : i32
    %c0_i32_0 = arith.constant 0 : i32
    %c0_i32_1 = arith.constant 0 : i32
    return %c0_i32, %c0_i32_0 : i32, i32
  }
  func.func @transform_12(%arg0: i32) -> (i32, i32) {
    %c0_i32 = arith.constant 0 : i32
    %c0_i32_0 = arith.constant 0 : i32
    %c0_i32_1 = arith.constant 0 : i32
    return %c0_i32, %c0_i32_0 : i32, i32
  }
  func.func @transform_13(%arg0: i32) -> (i32, i32) {
    %c0_i32 = arith.constant 0 : i32
    %c0_i32_0 = arith.constant 0 : i32
    %c0_i32_1 = arith.constant 0 : i32
    return %c0_i32, %c0_i32_0 : i32, i32
  }
  func.func @transform_14(%arg0: i32) -> (i32, i32) {
    %c0_i32 = arith.constant 0 : i32
    %c0_i32_0 = arith.constant 0 : i32
    %c0_i32_1 = arith.constant 0 : i32
    return %c0_i32, %c0_i32_0 : i32, i32
  }
  func.func @transform_15(%arg0: i32) -> (i32, i32) {
    %c0_i32 = arith.constant 0 : i32
    %c0_i32_0 = arith.constant 0 : i32
    %c0_i32_1 = arith.constant 0 : i32
    return %c0_i32, %c0_i32_0 : i32, i32
  }
  func.func @transform_16(%arg0: i32) -> (i32, i32) {
    %c0_i32 = arith.constant 0 : i32
    %c0_i32_0 = arith.constant 0 : i32
    %c0_i32_1 = arith.constant 0 : i32
    return %c0_i32, %c0_i32_0 : i32, i32
  }
  func.func @transform_17(%arg0: i32) -> (i32, i32, i32) {
    %c0_i32 = arith.constant 0 : i32
    %c0_i32_0 = arith.constant 0 : i32
    %c0_i32_1 = arith.constant 0 : i32
    return %arg0, %c0_i32, %c0_i32_0 : i32, i32, i32
  }
}

</mosaic_0001>

<bundles_post_ra>
// kernel: tpu_custom_call.1
= control target key start
LH: loop header
LB: loop body
LE: loop exit
PB: predicated region body
PF: predicated region fallthrough
CT: control target
= control target key end

     0   :  { %s3136_s0 = inlined_call_operand.hbm [shape: f32[2,8,32], index: 0, kind: input, shape index: {}]   ;;  %s3137_s1 = inlined_call_operand.vmem [shape: f32[32,32], index: 1, kind: input, shape index: {}]   ;;  %s3138_s2 = inlined_call_operand.vmem [shape: f32[1,32], index: 2, kind: input, shape index: {}]   ;;  %s3139_s3 = inlined_call_operand.vmem [shape: f32[32,32], index: 3, kind: input, shape index: {}]   ;;  %s3140_s4 = inlined_call_operand.vmem [shape: f32[1,32], index: 4, kind: input, shape index: {}]   ;;  %s3141_s5 = inlined_call_operand.vmem [shape: f32[32,32], index: 5, kind: input, shape index: {}]   ;;  %s3142_s6 = inlined_call_operand.vmem [shape: f32[1,32], index: 6, kind: input, shape index: {}]   ;;  %s3143_s7 = inlined_call_operand.hbm [shape: f32[32,32], index: 7, kind: input, shape index: {}]   ;;  %s3144_s8 = inlined_call_operand.vmem [shape: f32[1,32], index: 8, kind: input, shape index: {}]   ;;  %s3145_s9 = inlined_call_operand.vmem [shape: f32[1,32], index: 9, kind: input, shape index: {}]   ;;  %s3146_s10 = inlined_call_operand.vmem [shape: f32[1,32], index: 10, kind: input, shape index: {}]   ;;  %s3147_s11 = inlined_call_operand.hbm [shape: f32[32,64], index: 11, kind: input, shape index: {}]   ;;  %s3148_s12 = inlined_call_operand.vmem [shape: f32[1,64], index: 12, kind: input, shape index: {}]   ;;  %s3149_s13 = inlined_call_operand.vmem [shape: f32[64,32], index: 13, kind: input, shape index: {}]   ;;  %s3150_s14 = inlined_call_operand.vmem [shape: f32[1,32], index: 14, kind: input, shape index: {}]   ;;  %s3151_s15 = inlined_call_operand.vmem [shape: f32[1,32], index: 15, kind: input, shape index: {}]   ;;  %s3152_s16 = inlined_call_operand.vmem [shape: f32[1,32], index: 16, kind: input, shape index: {}]   ;;  %s3153_s17 = inlined_call_operand.hbm [shape: f32[2,8,32], index: 17, kind: output, shape index: {}]  }
   0x1   :  { %3167 = sst [smem:[#allocation18_spill]] %s3136_s0 }
   0x2   :  { %3168 = sst [smem:[#allocation19_spill]] %s3137_s1 }
   0x3   :  { %3169 = sst [smem:[#allocation20_spill]] %s3143_s7 }
   0x4   :  { %3170 = sst [smem:[#allocation21_spill]] %s3147_s11 }
   0x5   :  { %3171 = sst [smem:[#allocation22_spill]] %s3151_s15 }
   0x6   :  { %3172 = sst [smem:[#allocation23_spill]] %s3152_s16 }
   0x7   :  { %3173 = sst [smem:[#allocation24_spill]] %s3153_s17 }
   0x8   :  { %22 = vsyncpa [#allocation3], 0 }
   0x9   :  { %24 = vsyncpa [#allocation3 + $0x1], 0 }
   0xa   :  { %25 = vsyncpa [#allocation6], 0 }
   0xb   :  { %26 = vsyncpa [#allocation4], 0 }
   0xc   :  { %28 = vsyncpa [#allocation4 + $0x1], 0  ;;  %s2726_s24 = smov 0   ;;  %s2728_s25 = smov 0  }
   0xd   :  { %s2730_s26 = smov 0   ;;  %s2732_s27 = smov 0  }
   0xe LB: > { %3174 = sst [smem:[#allocation12_spill]] %s2611_s24  ;;  %s2747_s28 = sadd.s32 4294967295, %s2623_s27   ;;  %s2623_s27 = sphi %s2732_s27, %s3205_s27   ;;  %s2619_s26 = sphi %s2730_s26, %s3207_s26   ;;  %s2615_s25 = sphi %s2728_s25, %s3209_s25   ;;  %s2611_s24 = sphi %s2726_s24, %s3208_s24  }
   0xf   : > { %3175 = sst [smem:[#allocation13_spill]] %s2619_s26  ;;  %s2156_s29 = sadd.s32 4294967294, %s2623_s27  }
  0x10   : > { %3176 = sst [smem:[#allocation14_spill]] %s2623_s27  ;;  %p54_p0 = scmp.ne.s32.totalorder %s2615_s25, %s2611_s24 }
  0x11   : > { %p3158_p1 = scmp.eq.s32.totalorder %s2747_s28, 0  ;;  %p420_p3 = scmp.eq.s32.totalorder %s2156_s29, 1 }
  0x12   : > { %p2157_p5 = scmp.ge.s32.totalorder %s2623_s27, 1  ;;  %p427_p7 = scmp.lt.s32.totalorder %s2623_s27, 3 }
  0x13   : > { %p2756_p4 = por %p3158_p1, %p54_p0  ;;  %p2761_p6 = por %p420_p3, %p54_p0 }
  0x14   : > { %p2766_p8 = pnand %p2157_p5, %p427_p7  ;;  %s2625_s19 = smov [#allocation5]  }
  0x15   : > { %s3177_s0 = scalar_select %p2756_p4, 1, 0 }
  0x16   : > { %s3178_s30 = scalar_select %p2761_p6, 1, 0 }
  0x17   : > { %s3180_s18 = scalar_select %p2766_p8, 1, 0 }
  0x18   : > { %3179 = sst [smem:[#allocation15_spill]] %s3178_s30  ;;  %s457_s1 = sshll.u32 %s2625_s19, 4  ;;  %s458_s1 = int_to_ptr.vmem [resolvable:$true] %s457_s1 }
  0x19   : > { %p2391_p9 = pneg %p2766_p8  ;;  %s2626_s21 = smov [#allocation7]  }
  0x1a   : > { %s479_s22 = sshll.u32 %s2626_s21, 4  ;;  %s2486_s23 = scalar_lea.vmem %s458_s1, 512  ;;  %s480_s22 = int_to_ptr.vmem [resolvable:$true] %s479_s22 }
  0x1b   : > { %p2775_p11 = pnand %p2391_p9, %p3158_p1  ;;  %p2487_p13 = scmp.ne.s32.totalorder %s458_s1, %s2486_s23 }
  0x1c   : > { %p2494_p5 = scmp.lt.s32.totalorder %s458_s1, %s458_s1  ;;  %p2495_p7 = scmp.lt.s32.totalorder %s2486_s23, %s2486_s23 }
  0x1d   : > { %p2477_p12 = pneg %p2775_p11 }
  0x1e   : > { %p2496_p10 = por %p2495_p7, %p2494_p5 }
  0x1f   : > { %p2489_p0 = pnand %p2487_p13, %p2477_p12 }
  0x21   : > { %p2490_p3 = pneg %p2489_p0 }
  0x23   : > { %p2497_p9 = pnand %p2496_p10, %p2490_p3 }
  0x25   : > { %2500 = shalt.err (!%p2497_p9)
}
  0x26   : > { %s2627_s29 = smov 128   ;;  %s2628_s19 = smov 8  }
  0x27   : > { %s3182_s7 = sld [smem:[#allocation20_spill]]  ;;  %s2512_s24 = scalar_lea.vmem %s480_s22, 512 }
  0x28   : > { %p2513_p1 = scmp.ne.s32.totalorder %s480_s22, %s2512_s24  ;;  %p2520_p2 = scmp.lt.s32.totalorder %s480_s22, %s480_s22 }
  0x29   : > { %p2521_p6 = scmp.lt.s32.totalorder %s2512_s24, %s2512_s24 }
  0x2a   : > { %p2515_p13 = pnand %p2513_p1, %p2477_p12 }
  0x2b   : > { %p2522_p5 = por %p2521_p6, %p2520_p2 }
  0x2c   : > { %p2516_p0 = pneg %p2515_p13 }
  0x2d   : > { %2394 = dma.hbm_to_vmem [thread:$0]  (!%p2775_p11), %s3182_s7, 512, %s458_s1, [#allocation6], %s2627_s29, %s2627_s29, %s2628_s19  }
  0x2e   : > { %p2523_p10 = pnand %p2522_p5, %p2516_p0 }
  0x30   : > { %2526 = shalt.err (!%p2523_p10)
}
  0x31   : > { %s3183_s11 = sld [smem:[#allocation21_spill]]  ;;  %s2798_s24 = sadd.s32 1, %s2623_s27  }
  0x32   : > { %3184 = sst [smem:[#allocation16_spill]] %s2798_s24  ;;  %s41_s30 = sadd.s32 1, %s2619_s26 }
  0x33   : > { %s38_s1 = ssub.s32 %s2623_s27, %s2798_s24  ;;  %p48_p1 = scmp.ne.s32.totalorder %s2619_s26, %s2615_s25 }
  0x34   : > { %p39_p2 = scmp.eq.s32.totalorder %s38_s1, 0  ;;  %p49_p6 = scmp.eq.s32.totalorder %s2623_s27, 0 }
  0x35   : > { %p3185_p12 = scmp.eq.s32.totalorder %s2747_s28, 1  ;;  %p2408_p7 = scmp.lt.s32.totalorder %s2623_s27, 2 }
  0x36   : > { %s2814_s20 = scalar_select %p39_p2, %s2619_s26, %s41_s30  }
  0x37   : > { %2397 = dma.hbm_to_vmem [thread:$0]  (!%p2775_p11), %s3183_s11, 512, %s480_s22, [#allocation6], %s2627_s29, %s2627_s29, %s2628_s19  }
  0x38   : > { %p2808_p3 = por %p3185_p12, %p48_p1  ;;  %3187 = sst [smem:[#allocation17_spill]] %s2814_s20 }
  0x39   : > { %p50_p9 = por %p49_p6, %p48_p1  ;;  %s508_s21 = sand.u32 1, %s2619_s26  }
  0x3a   : > { %s3186_s17 = scalar_select %p2808_p3, 1, 0 }
  0x3b   : > { %s2161_s23 = sshll.u32 %s508_s21, 3  ;;  %s2162_s22 = sshll.u32 %s2623_s27, 7 }
  0x3c   : > { %s3188_s7 = sld [smem:[#allocation18_spill]]  ;;  %s512_s1 = scalar_lea.vmem [#allocation2], %s2161_s23 }
  0x3d   : > { %s519_s24 = sshll.u32 %s512_s1, 4  ;;  %p2823_p11 = pnand %p2408_p7, %p50_p9  ;;  %s520_s24 = int_to_ptr.vmem [resolvable:$true] %s519_s24 }
  0x3e   : > { %s509_s30 = scalar_lea.sflag [#allocation3], %s508_s21 }
  0x3f   : > { %p2529_p0 = pneg %p2823_p11 }
  0x42   : > { %s2821_s11 = scalar_lea.hbm %s3188_s7, %s2162_s22  ;;  %s2532_s19 = scalar_lea.hbm %s3188_s7, 256 }
  0x43   : > { %s2527_s20 = scalar_lea.hbm %s2821_s11, 128  ;;  %p2533_p1 = scmp.lt.s32.totalorder %s2821_s11, %s3188_s7 }
  0x44   : > { %p2528_p13 = scmp.ne.s32.totalorder %s2821_s11, %s2527_s20  ;;  %p2534_p2 = scmp.lt.s32.totalorder %s2532_s19, %s2527_s20 }
  0x46   : > { %p2530_p5 = pnand %p2529_p0, %p2528_p13  ;;  %p2535_p6 = por %p2534_p2, %p2533_p1 }
  0x48   : > { %p2531_p10 = pneg %p2530_p5 }
  0x4a   : > { %p2536_p12 = pnand %p2535_p6, %p2531_p10 }
  0x4c   : > { %2539 = shalt.err (!%p2536_p12)
}
  0x4d   : > { %s2540_s1 = scalar_lea.vmem %s520_s24, 128  ;;  %s2629_s21 = smov [#allocation2]  }
  0x4e   : > { %p2541_p7 = scmp.ne.s32.totalorder %s520_s24, %s2540_s1  ;;  %s2545_s27 = sshll.u32 %s2629_s21, 4  ;;  %s2546_s27 = int_to_ptr.vmem [resolvable:$false] %s2545_s27 }
  0x4f   : > { %s2547_s15 = scalar_lea.vmem %s2546_s27, 256  ;;  %p2548_p13 = scmp.lt.s32.totalorder %s520_s24, %s2546_s27 }
  0x50   : > { %p2543_p9 = pnand %p2541_p7, %p2529_p0  ;;  %p2549_p5 = scmp.lt.s32.totalorder %s2547_s15, %s2540_s1 }
  0x52   : > { %p2544_p3 = pneg %p2543_p9  ;;  %p2550_p4 = por %p2549_p5, %p2548_p13 }
  0x54   : > { %p2551_p8 = pnand %p2550_p4, %p2544_p3 }
  0x56   : > { %2554 = shalt.err (!%p2551_p8)
}
  0x57   : > { %2401 = dma.hbm_to_vmem [thread:$0]  (!%p2823_p11), %s2821_s11, 128, %s520_s24, %s509_s30  }
  0x58   : > { %p3190_p10 = scmp.ne.s32.totalorder %s3180_s18, 0 }
  0x59   : > { %s2844_s26 = sand.u32 (!%p3190_p10), 1, %s2615_s25   ;;  %p3191_p4 = scmp.ne.s32.totalorder (!%p3190_p10), %s3177_s0, 0 }
  0x5a   : > { %528 = sbr.rel (%p3190_p10) target bundleno = 3575 (0xdf7), region = 88  ;;  %s2164_s20 = sshll.u32 (!%p3190_p10), %s2844_s26, 3 }
  0x5b   : > { %s531_s27 = scalar_lea.sflag (!%p3190_p10), [#allocation3], %s2844_s26  ;;  %s534_s15 = scalar_lea.vmem (!%p3190_p10), [#allocation2], %s2164_s20 }
  0x5f   : > { %2598 = dma.done.wait (%p3191_p4), %s531_s27, 128  }
  0x60   : > { %2600 = vsyncadd (%p3191_p4), %s531_s27, 4294967168  ;;  %p3192_p8 = scmp.eq.s32.totalorder %s2747_s28, 0 }
  0x62   : > { %2602 = dma.done.wait (%p3192_p8), [#allocation6], 1024   ;;  %p3193_p3 = pmov %p3192_p8 }
  0x63   : > { %v2630_v0 = vmov 0.0   ;;  %vm2631_vm0 = vmmov 0   ;;  %v682_v1 = vld [vmem:[%s3139_s3 + $0x18] sm:$0xff]  ;;  %s3194_s24 = sld [smem:[#allocation19_spill]]  ;;  %v681_v3 = vld [vmem:[%s3139_s3 + $0x10] sm:$0xff]  ;;  %v680_v5 = vld [vmem:[%s3139_s3 + $0x8] sm:$0xff]  ;;  %v841_v28 = vlaneseq }
  0x64   : > { %2604 = vsyncadd (%p3193_p3), [#allocation6], 4294966272  ;;  %2267 = vmatprep.subr.mxu1 %v2630_v0  ;;  %2256 = vmatprep.subr.mxu0 %v2630_v0  ;;  %v679_v7 = vld [vmem:[%s3139_s3] sm:$0xff]  ;;  %vm605_vm1 = vcmask 261120   ;;  %v763_v10 = vld [vmem:[%s3141_s5 + $0x18] sm:$0xff]  ;;  %vm850_vm2 = vcmask 64512  }
  0x65   : > { %2275 = vmatprep.mubr.msk.f32.mxu1 %vm2631_vm0, %v2630_v0  ;;  %2264 = vmatprep.mubr.msk.f32.mxu0 %vm2631_vm0, %v2630_v0  ;;  %v2892_v9 = vld [vmem:[%s534_s15] sm:$0xff]  ;;  %v762_v11 = vld [vmem:[%s3141_s5 + $0x10] sm:$0xff]  ;;  %v2959_v29 = vshrl.u32 %v841_v28, 7  ;;  %v2961_v30 = vand.u32 127, %v841_v28  ;;  %s2633_s15 = smov 112   ;;  %v847_v52 = vld [vmem:[#allocation5 + $0x8] sm:$0xff] }
  0x66   : > { %2268 = vmatpush3.msra.mxu1 %v682_v1  ;;  %v761_v12 = vld [vmem:[%s3141_s5 + $0x8] sm:$0xff]  ;;  %v760_v13 = vld [vmem:[%s3141_s5] sm:$0xff]  ;;  %v846_v57 = vld [vmem:[#allocation5] sm:$0xff]  ;;  %s2634_s19 = smov 104   ;;  %vm1948_vm4 = vcmask 523264   ;;  %s3196_s21 = sld [smem:[#allocation22_spill]] }
  0x67   : > { %2269 = vmatprep.subr.mxu1 %v2630_v0  ;;  %v2170_v14 = vld [vmem:[%s3140_s4] ss:$0 sm:$0xff]  ;;  %vm845_vm3 = vcmp.ge.s32.totalorder %v2959_v29, %v2961_v30  ;;  %s3197_s16 = sld [smem:[#allocation23_spill]]  ;;  %s2200_s0 = sshll.u32 %s2747_s28, 7 }
  0x68   : > { %2270 = vmatpush3.msra.mxu1 %v681_v3  ;;  %v2168_v15 = vld [vmem:[%s3138_s2] ss:$0 sm:$0xff]  ;;  %s592_s18 = scalar_lea.vmem [#allocation8], %s2164_s20  ;;  %s2054_s23 = scalar_lea.sflag [#allocation4], %s2844_s26 }
  0x69   : > { %s3195_s30 = smov %s3194_s24  ;;  %v597_v2 = vld [vmem:[%s3194_s24 + $0x18] sm:$0xff]  ;;  %2271 = vmatprep.subr.mxu1 %v2630_v0  ;;  %s2632_s24 = smov 120   ;;  %v2172_v22 = vld [vmem:[%s3142_s6] ss:$0 sm:$0xff] }
  0x6a   : > { %2257 = vmatpush3.msra.mxu0 %v597_v2  ;;  %v596_v4 = vld [vmem:[%s3195_s30 + $0x10] sm:$0xff]  ;;  %v595_v6 = vld [vmem:[%s3195_s30 + $0x8] sm:$0xff]  ;;  %v594_v8 = vld [vmem:[%s3195_s30] sm:$0xff]  ;;  %2272 = vmatpush3.msra.mxu1 %v680_v5  ;;  %p3199_p0 = scmp.ne.s32.totalorder %s3186_s17, 0 }
  0x6b   : > { %2258 = vmatprep.subr.mxu0 %v2630_v0  ;;  %2273 = vmatprep.subr.mxu1 %v2630_v0 }
  0x6c   : > { %2259 = vmatpush3.msra.mxu0 %v596_v4  ;;  %2274 = vmatpush3.msra.mxu1 %v679_v7 }
  0x6d   : > { %2260 = vmatprep.subr.mxu0 %v2630_v0  ;;  %2276 = vmatmul.mubr.msk.f32.vlgmr.msra.gmra.mxu1 %vm605_vm1, %v2892_v9 }
  0x6e   : > { %2261 = vmatpush3.msra.mxu0 %v595_v6  ;;  %2294 = vmatprep.subr.mxu1 %v2630_v0 }
  0x6f   : > { %2262 = vmatprep.subr.mxu0 %v2630_v0  ;;  %2296 = vmatprep.mubr.msk.f32.mxu1 %vm2631_vm0, %v2630_v0 }
  0x70   : > { %2263 = vmatpush3.msra.mxu0 %v594_v8 }
  0x71   : > { %2265 = vmatmul.mubr.msk.f32.vlgmr.msra.gmra.mxu0 %vm605_vm1, %v2892_v9  ;;  %2278 = vmatprep.subr.mxu0 %v2630_v0 }
  0x72   : > { %2286 = vmatprep.mubr.msk.f32.mxu0 %vm2631_vm0, %v2630_v0  ;;  %2279 = vmatpush3.msra.mxu0 %v763_v10 }
  0x73   : > { %2280 = vmatprep.subr.mxu0 %v2630_v0 }
  0x74   : > { %2281 = vmatpush3.msra.mxu0 %v762_v11 }
  0x75   : > { %2282 = vmatprep.subr.mxu0 %v2630_v0 }
  0x76   : > { %2283 = vmatpush3.msra.mxu0 %v761_v12 }
  0x77   : > { %2284 = vmatprep.subr.mxu0 %v2630_v0 }
  0x78   : > { %2285 = vmatpush3.msra.mxu0 %v760_v13 }
  0x79   : > { %2287 = vmatmul.mubr.msk.f32.vlgmr.msra.gmra.mxu0 %vm605_vm1, %v2892_v9  ;;  %2289 = vmatprep.subr.mxu0 %v2630_v0 }
  0x7a   : > { %2291 = vmatprep.mubr.msk.f32.mxu0 %vm2631_vm0, %v2630_v0 }
 0x12d   : > { %v756_v16 = vpop.f32.mrf.mxu1 }
 0x12e   : > { %v2932_v18 = vadd.f32 %v2170_v14, %v756_v16 }
 0x12f   : > { %v2277_v20 = vpop.f32.mrf.mxu1 }
 0x130   : > { %1014 = vrot.lane.b32.xlu0 %v2932_v18, %s2632_s24  ;;  %2290 = vmatpush3.xpose.msk.msra.mxu0 %vm850_vm2, %v2932_v18 }
 0x131   : > { %v675_v17 = vpop.f32.mrf.mxu0  ;;  %2299 = vmatprep.subr.mxu0 %v2630_v0 }
 0x132   : > { %v2934_v19 = vadd.f32 %v2168_v15, %v675_v17 }
 0x133   : > { %v2266_v21 = vpop.f32.mrf.mxu0 }
 0x134   : > { %2292 = vmatmul.mubr.msk.f32.vlgmr.msra.gmra.mxu0 %vm850_vm2, %v2934_v19  ;;  %1012 = vrot.lane.b32.xlu0 %v2934_v19, %s2632_s24 }
 0x135   : > { %2301 = vmatprep.mubr.msk.f32.mxu0 %vm2631_vm0, %v2630_v0 }
 0x139   : > { %v837_v23 = vpop.f32.mrf.mxu0 }
 0x13a   : > { %v2950_v24 = vadd.f32 %v2172_v22, %v837_v23 }
 0x13b   : > { %v2288_v25 = vpop.f32.mrf.mxu0 }
 0x13c   : > { %2295 = vmatpush3.msra.mxu1 %v2950_v24 }
 0x13d   : > { %2304 = vmatprep.subr.mxu1 %v2630_v0 }
 0x1a2   : > { %v1015_v26 = vpop.permute.xlu0 %1014 }
 0x1a3   : > { %2300 = vmatpush3.xpose.msk.msra.mxu0 %vm850_vm2, %v1015_v26 }
 0x1a4   : > { %2309 = vmatprep.subr.mxu0 %v2630_v0 }
 0x1a6   : > { %v1013_v27 = vpop.permute.xlu0 %1012 }
 0x1a7   : > { %2302 = vmatmul.mubr.msk.f32.vlgmr.msra.gmra.mxu0 %vm850_vm2, %v1013_v27 }
 0x1a8   : > { %2311 = vmatprep.mubr.msk.f32.mxu0 %vm2631_vm0, %v2630_v0  ;;  %2310 = vmatpush3.msra.mxu0 %v847_v52 }
 0x1a9   : > { %2319 = vmatprep.subr.mxu0 %v2630_v0 }
 0x1f4   : > { %v923_v31 = vpop.f32.mrf.mxu0 }
 0x1f5   : > { %v927_v32 = vsel %vm845_vm3, %v923_v31, -1e+30 }
 0x1f6   : > { %v2293_v33 = vpop.f32.mrf.mxu0  ;;  %v928_v34 = vsel %vm850_vm2, %v927_v32, -inf }
 0x1f7   : > { %929 = vmax.xlane.f32.xlu1 %v928_v34 }
 0x267   : > { %v1086_v35 = vpop.f32.mrf.mxu0 }
 0x268   : > { %v1090_v36 = vsel %vm845_vm3, %v1086_v35, -1e+30 }
 0x269   : > { %v2303_v37 = vpop.f32.mrf.mxu0  ;;  %v1091_v38 = vsel %vm850_vm2, %v1090_v36, -inf }
 0x26a   : > { %1092 = vmax.xlane.f32.xlu1 %v1091_v38 }
 0x280   : > { %v930_v39 = vpop.xlane.xlu1 %929 }
 0x281   : > { %v931_v40 = vsub.f32 %v927_v32, %v930_v39 }
 0x283   : > { %v932_v41 = vmul.f32 1.442695, %v931_v40 }
 0x285   : > { %2453 = vpow2.f32 %v932_v41 }
 0x292   : > { %v2454_v42 = vpop.eup %2453 }
 0x293   : > { %v934_v43 = vsel %vm850_vm2, %v2454_v42, 0.0 }
 0x294   : > { %935 = vadd.xlane.f32.xlu0 %v934_v43 }
 0x2aa   : > { %1415 = vrot.lane.b32.xlu0 %v2950_v24, %s2633_s15 }
 0x2f3   : > { %v1093_v44 = vpop.xlane.xlu1 %1092 }
 0x2f4   : > { %v1094_v45 = vsub.f32 %v1090_v36, %v1093_v44  ;;  %v849_v36 = vld [vmem:[#allocation5 + $0x18] sm:$0xff] }
 0x2f6   : > { %v1095_v46 = vmul.f32 1.442695, %v1094_v45  ;;  %v2190_v45 = vld [vmem:[%s3144_s8] ss:$0 sm:$0xff] }
 0x2f8   : > { %2455 = vpow2.f32 %v1095_v46 }
 0x305   : > { %v2456_v47 = vpop.eup %2455 }
 0x306   : > { %v1097_v48 = vsel %vm850_vm2, %v2456_v47, 0.0 }
 0x307   : > { %1098 = vadd.xlane.f32.xlu1 %v1097_v48 }
 0x318   : > { %1103 = vrot.lane.b32.xlu1 %v2950_v24, %s2632_s24  ;;  %s2067_s24 = sshll.u32 %s592_s18, 4  ;;  %s2068_s24 = int_to_ptr.vmem [resolvable:$true] %s2067_s24 }
 0x319   : > { %s2555_s1 = scalar_lea.vmem %s2068_s24, 128 }
 0x31a   : > { %p2556_p11 = scmp.ne.s32.totalorder %s2068_s24, %s2555_s1 }
 0x31c   : > { %1327 = vrot.lane.b32.xlu1 %v2932_v18, %s2633_s15  ;;  %p2557_p1 = pnand %p2556_p11, %p3199_p0 }
 0x31d   : > { %v936_v49 = vpop.xlane.xlu0 %935 }
 0x31e   : > { %2457 = vrcp.f32 %v936_v49  ;;  %p2558_p2 = pneg %p2557_p1 }
 0x320   : > { %1325 = vrot.lane.b32.xlu1 %v2934_v19, %s2633_s15  ;;  %s3198_s15 = sld [smem:[#allocation24_spill]] }
 0x321   : > { %v1416_v59 = vpop.permute.xlu0 %1415 }
 0x32b   : > { %v2458_v50 = vpop.eup %2457 }
 0x32c   : > { %v938_v51 = vmul.f32 %v2458_v50, %v2454_v42 }
 0x32e   : > { %2297 = vmatmul.mubr.msk.f32.vlgmr.msra.gmra.mxu1 %vm850_vm2, %v938_v51 }
 0x32f   : > { %2306 = vmatprep.mubr.msk.f32.mxu1 %vm2631_vm0, %v2630_v0 }
 0x390   : > { %v1099_v53 = vpop.xlane.xlu1 %1098 }
 0x391   : > { %2459 = vrcp.f32 %v1099_v53 }
 0x394   : > { %v1104_v54 = vpop.permute.xlu1 %1103 }
 0x395   : > { %2305 = vmatpush3.msra.mxu1 %v1104_v54 }
 0x396   : > { %2314 = vmatprep.subr.mxu1 %v2630_v0 }
 0x398   : > { %v1328_v61 = vpop.permute.xlu1 %1327 }
 0x39c   : > { %v1326_v1 = vpop.permute.xlu1 %1325 }
 0x39e   : > { %v2460_v55 = vpop.eup %2459 }
 0x39f   : > { %v1101_v56 = vmul.f32 %v2460_v55, %v2456_v47 }
 0x3a1   : > { %2307 = vmatmul.mubr.msk.f32.vlgmr.msra.gmra.mxu1 %vm850_vm2, %v1101_v56  ;;  %v1847_v56 = vld [vmem:[#allocation7 + $0x18] sm:$0xff] }
 0x3a2   : > { %2315 = vmatpush3.msra.mxu1 %v846_v57  ;;  %2316 = vmatprep.mubr.msk.f32.mxu1 %vm2631_vm0, %v2630_v0  ;;  %v1846_v57 = vld [vmem:[#allocation7 + $0x10] sm:$0xff] }
 0x3a3   : > { %2324 = vmatprep.subr.mxu1 %v2630_v0 }
 0x3ee   : > { %v1008_v58 = vpop.f32.mrf.mxu1 }
 0x3ef   : > { %2317 = vmatmul.mubr.msk.f32.vlgmr.msra.gmra.mxu1 %vm850_vm2, %v1008_v58  ;;  %v1845_v58 = vld [vmem:[#allocation7 + $0x8] sm:$0xff] }
 0x3f0   : > { %2325 = vmatpush3.msra.mxu1 %v1416_v59  ;;  %v2298_v60 = vpop.f32.mrf.mxu1  ;;  %2326 = vmatprep.mubr.msk.f32.mxu1 %vm2631_vm0, %v2630_v0 }
 0x3f1   : > { %2334 = vmatprep.subr.mxu1 %v2630_v0 }
 0x461   : > { %v1175_v62 = vpop.f32.mrf.mxu1 }
 0x462   : > { %2312 = vmatmul.mubr.msk.f32.vlgmr.msra.gmra.mxu0 %vm850_vm2, %v1175_v62 }
 0x463   : > { %2320 = vmatpush3.xpose.msk.msra.mxu0 %vm850_vm2, %v1328_v61  ;;  %v2308_v63 = vpop.f32.mrf.mxu1  ;;  %2321 = vmatprep.mubr.msk.f32.mxu0 %vm2631_vm0, %v2630_v0 }
 0x464   : > { %2329 = vmatprep.subr.mxu0 %v2630_v0  ;;  %v2191_v63 = vld [vmem:[%s3145_s9] ss:$0 sm:$0xff] }
 0x466   : > { %2322 = vmatmul.mubr.msk.f32.vlgmr.msra.gmra.mxu0 %vm850_vm2, %v1326_v1 }
 0x467   : > { %2331 = vmatprep.mubr.msk.f32.mxu0 %vm2631_vm0, %v2630_v0 }
 0x4af   : > { %v1321_v2 = vpop.f32.mrf.mxu1 }
 0x4b1   : > { %v2318_v3 = vpop.f32.mrf.mxu1 }
 0x522   : > { %v1248_v4 = vpop.f32.mrf.mxu0 }
 0x523   : > { %v1322_v37 = vadd.f32 %v1321_v2, %v1248_v4  ;;  %v2192_v2 = vld [vmem:[%s3146_s10] ss:$0 sm:$0xff] }
 0x524   : > { %v2313_v5 = vpop.f32.mrf.mxu0 }
 0x525   : > { %v1940_v5 = vld [vmem:[%s3149_s13 + $0x38] sm:$0xff] }
 0x526   : > { %v1399_v6 = vpop.f32.mrf.mxu0 }
 0x527   : > { %v1403_v7 = vsel %vm845_vm3, %v1399_v6, -1e+30  ;;  %v1939_v6 = vld [vmem:[%s3149_s13 + $0x30] sm:$0xff] }
 0x528   : > { %v2323_v8 = vpop.f32.mrf.mxu0  ;;  %v1404_v10 = vsel %vm850_vm2, %v1403_v7, -inf }
 0x529   : > { %1405 = vmax.xlane.f32.xlu1 %v1404_v10  ;;  %v1937_v8 = vld [vmem:[%s3149_s13 + $0x20] sm:$0xff]  ;;  %v1936_v10 = vld [vmem:[%s3149_s13 + $0x18] sm:$0xff] }
 0x5b2   : > { %v1406_v11 = vpop.xlane.xlu1 %1405 }
 0x5b3   : > { %v1407_v12 = vsub.f32 %v1403_v7, %v1406_v11  ;;  %v1938_v7 = vld [vmem:[%s3149_s13 + $0x28] sm:$0xff]  ;;  %v1935_v11 = vld [vmem:[%s3149_s13 + $0x10] sm:$0xff] }
 0x5b5   : > { %v1408_v13 = vmul.f32 1.442695, %v1407_v12  ;;  %v1934_v12 = vld [vmem:[%s3149_s13 + $0x8] sm:$0xff] }
 0x5b7   : > { %2461 = vpow2.f32 %v1408_v13  ;;  %v1933_v13 = vld [vmem:[%s3149_s13] sm:$0xff] }
 0x5c4   : > { %v2462_v14 = vpop.eup %2461 }
 0x5c5   : > { %v1410_v15 = vsel %vm850_vm2, %v2462_v14, 0.0 }
 0x5c6   : > { %1411 = vadd.xlane.f32.xlu0 %v1410_v15 }
 0x5dc   : > { %1567 = vrot.lane.b32.xlu0 %v2932_v18, %s2634_s19  ;;  %v848_v18 = vld [vmem:[#allocation5 + $0x10] sm:$0xff] }
 0x5dd   : > { %2330 = vmatpush3.msra.mxu0 %v848_v18 }
 0x5de   : > { %2339 = vmatprep.subr.mxu0 %v2630_v0 }
 0x5e0   : > { %1565 = vrot.lane.b32.xlu0 %v2934_v19, %s2634_s19 }
 0x64f   : > { %v1412_v16 = vpop.xlane.xlu0 %1411 }
 0x650   : > { %2463 = vrcp.f32 %v1412_v16 }
 0x653   : > { %v1568_v20 = vpop.permute.xlu0 %1567 }
 0x657   : > { %v1566_v22 = vpop.permute.xlu0 %1565 }
 0x65d   : > { %v2464_v17 = vpop.eup %2463 }
 0x65e   : > { %v1414_v21 = vmul.f32 %v2464_v17, %v2462_v14  ;;  %v2193_v14 = vld [vmem:[%s3148_s12] ss:$0 sm:$0xff] }
 0x660   : > { %2327 = vmatmul.mubr.msk.f32.vlgmr.msra.gmra.mxu1 %vm850_vm2, %v1414_v21 }
 0x661   : > { %2335 = vmatpush3.xpose.msk.msra.mxu1 %vm850_vm2, %v1568_v20  ;;  %2336 = vmatprep.mubr.msk.f32.mxu1 %vm2631_vm0, %v2630_v0 }
 0x662   : > { %2344 = vmatprep.subr.mxu1 %v2630_v0 }
 0x664   : > { %2337 = vmatmul.mubr.msk.f32.vlgmr.msra.gmra.mxu1 %vm850_vm2, %v1566_v22 }
 0x665   : > { %2346 = vmatprep.mubr.msk.f32.mxu1 %vm2631_vm0, %v2630_v0  ;;  %2345 = vmatpush3.msra.mxu1 %v849_v36 }
 0x666   : > { %2360 = vmatprep.subr.mxu1 %v2630_v0 }
 0x720   : > { %v1487_v19 = vpop.f32.mrf.mxu1 }
 0x721   : > { %2332 = vmatmul.mubr.msk.f32.vlgmr.msra.gmra.mxu0 %vm850_vm2, %v1487_v19 }
 0x722   : > { %v2328_v23 = vpop.f32.mrf.mxu1  ;;  %2341 = vmatprep.mubr.msk.f32.mxu0 %vm2631_vm0, %v2630_v0 }
 0x724   : > { %v1639_v25 = vpop.f32.mrf.mxu1 }
 0x725   : > { %v1643_v26 = vsel %vm845_vm3, %v1639_v25, -1e+30 }
 0x726   : > { %v2338_v27 = vpop.f32.mrf.mxu1  ;;  %v1644_v28 = vsel %vm850_vm2, %v1643_v26, -inf }
 0x727   : > { %1645 = vmax.xlane.f32.xlu0 %v1644_v28 }
 0x7b0   : > { %v1646_v31 = vpop.xlane.xlu0 %1645 }
 0x7b1   : > { %v1647_v32 = vsub.f32 %v1643_v26, %v1646_v31 }
 0x7b3   : > { %v1648_v33 = vmul.f32 1.442695, %v1647_v32 }
 0x7b5   : > { %2465 = vpow2.f32 %v1648_v33 }
 0x7c2   : > { %v2466_v34 = vpop.eup %2465 }
 0x7c3   : > { %v1650_v35 = vsel %vm850_vm2, %v2466_v34, 0.0 }
 0x7c4   : > { %1651 = vadd.xlane.f32.xlu1 %v1650_v35 }
 0x7d5   : > { %1655 = vrot.lane.b32.xlu1 %v2950_v24, %s2634_s19  ;;  %s2065_s19 = scalar_lea.hbm %s3198_s15, %s2200_s0 }
 0x7e1   : > { %v1560_v29 = vpop.f32.mrf.mxu0 }
 0x7e2   : > { %v1564_v30 = vadd.f32 %v1560_v29, %v1322_v37 }
 0x7e3   : > { %v2333_v38 = vpop.f32.mrf.mxu0 }
 0x7e4   : > { %v2197_v38 = vld [vmem:[%s3196_s21] ss:$0 sm:$0xff]  ;;  %s2635_s21 = smov [#allocation8]  }
 0x7e5   : > { %s2559_s28 = sshll.u32 %s2635_s21, 4  ;;  %s2560_s28 = int_to_ptr.vmem [resolvable:$false] %s2559_s28 }
 0x7e6   : > { %s2561_s20 = scalar_lea.vmem %s2560_s28, 256  ;;  %p2562_p6 = scmp.lt.s32.totalorder %s2068_s24, %s2560_s28 }
 0x7e7   : > { %p2563_p12 = scmp.lt.s32.totalorder %s2561_s20, %s2555_s1 }
 0x7e9   : > { %p2564_p7 = por %p2563_p12, %p2562_p6 }
 0x7eb   : > { %p2565_p9 = pnand %p2564_p7, %p2558_p2 }
 0x84d   : > { %v1652_v39 = vpop.xlane.xlu1 %1651 }
 0x84e   : > { %2467 = vrcp.f32 %v1652_v39 }
 0x851   : > { %v1656_v40 = vpop.permute.xlu1 %1655 }
 0x852   : > { %2340 = vmatpush3.msra.mxu0 %v1656_v40  ;;  %v2198_v40 = vld [vmem:[%s3197_s16] ss:$0 sm:$0xff] }
 0x853   : > { %2349 = vmatprep.subr.mxu0 %v2630_v0 }
 0x85b   : > { %v2468_v41 = vpop.eup %2467 }
 0x85c   : > { %v1654_v42 = vmul.f32 %v2468_v41, %v2466_v34 }
 0x85e   : > { %2342 = vmatmul.mubr.msk.f32.vlgmr.msra.gmra.mxu0 %vm850_vm2, %v1654_v42 }
 0x85f   : > { %2357 = vmatprep.mubr.msk.f32.mxu0 %vm2631_vm0, %v2630_v0  ;;  %2350 = vmatpush3.msra.mxu0 %v1847_v56 }
 0x860   : > { %2351 = vmatprep.subr.mxu0 %v2630_v0 }
 0x861   : > { %2352 = vmatpush3.msra.mxu0 %v1846_v57 }
 0x862   : > { %2353 = vmatprep.subr.mxu0 %v2630_v0 }
 0x863   : > { %2354 = vmatpush3.msra.mxu0 %v1845_v58 }
 0x864   : > { %2355 = vmatprep.subr.mxu0 %v2630_v0 }
 0x91e   : > { %v1727_v24 = vpop.f32.mrf.mxu0 }
 0x91f   : > { %2347 = vmatmul.mubr.msk.f32.vlgmr.msra.gmra.mxu1 %vm850_vm2, %v1727_v24 }
 0x920   : > { %v2343_v43 = vpop.f32.mrf.mxu0  ;;  %2376 = vmatprep.mubr.msk.f32.mxu1 %vm2631_vm0, %v2630_v0  ;;  %2361 = vmatpush3.msra.mxu1 %v1940_v5 }
 0x921   : > { %2362 = vmatprep.subr.mxu1 %v2630_v0 }
 0x922   : > { %2363 = vmatpush3.msra.mxu1 %v1939_v6 }
 0x923   : > { %2364 = vmatprep.subr.mxu1 %v2630_v0 }
 0x924   : > { %2365 = vmatpush3.msra.mxu1 %v1938_v7 }
 0x925   : > { %2366 = vmatprep.subr.mxu1 %v2630_v0 }
 0x926   : > { %2367 = vmatpush3.msra.mxu1 %v1937_v8 }
 0x927   : > { %2368 = vmatprep.subr.mxu1 %v2630_v0 }
 0x928   : > { %2369 = vmatpush3.msra.mxu1 %v1936_v10 }
 0x929   : > { %2370 = vmatprep.subr.mxu1 %v2630_v0 }
 0x92a   : > { %2371 = vmatpush3.msra.mxu1 %v1935_v11 }
 0x92b   : > { %2372 = vmatprep.subr.mxu1 %v2630_v0 }
 0x92c   : > { %2373 = vmatpush3.msra.mxu1 %v1934_v12 }
 0x92d   : > { %2374 = vmatprep.subr.mxu1 %v2630_v0  ;;  %v2195_v0 = vld [vmem:[%s3150_s14] ss:$0 sm:$0xff] }
 0x92e   : > { %2375 = vmatpush3.msra.mxu1 %v1933_v13 }
 0x9df   : > { %v1800_v44 = vpop.f32.mrf.mxu1 }
 0x9e0   : > { %v1804_v46 = vadd.f32 %v1800_v44, %v1564_v30 }
 0x9e1   : > { %v2348_v47 = vpop.f32.mrf.mxu1 }
 0x9e2   : > { %v1812_v48 = vadd.f32 %v2190_v45, %v1804_v46 }
 0x9e4   : > { %v1813_v49 = vadd.f32 %v1812_v48, %v2892_v9  ;;  %v1844_v9 = vld [vmem:[#allocation7] sm:$0xff] }
 0x9e5   : > { %2356 = vmatpush3.msra.mxu0 %v1844_v9 }
 0x9e6   : > { %v1816_v50 = vsel %vm605_vm1, %v1813_v49, 0.0 }
 0x9e7   : > { %1817 = vadd.xlane.f32.xlu1 %v1816_v50 }
 0xa70   : > { %v1818_v51 = vpop.xlane.xlu1 %1817 }
 0xa71   : > { %v1820_v52 = vmul.f32 0.03125, %v1818_v51 }
 0xa73   : > { %v1821_v53 = vsub.f32 %v1813_v49, %v1820_v52 }
 0xa75   : > { %v1822_v54 = vmul.f32 %v1821_v53, %v1821_v53 }
 0xa77   : > { %v1823_v55 = vsel %vm605_vm1, %v1822_v54, 0.0 }
 0xa78   : > { %1824 = vadd.xlane.f32.xlu0 %v1823_v55 }
 0xb01   : > { %v1825_v59 = vpop.xlane.xlu0 %1824 }
 0xb02   : > { %v1826_v60 = vmul.f32 0.03125, %v1825_v59 }
 0xb04   : > { %v1827_v61 = vadd.f32 1e-05, %v1826_v60 }
 0xb06   : > { %2469 = vrsqrt.f32 %v1827_v61 }
 0xb13   : > { %v2470_v62 = vpop.eup %2469 }
 0xb14   : > { %v1829_v1 = vmul.f32 %v2470_v62, %v1821_v53 }
 0xb16   : > { %v1836_v3 = vmul.f32 %v2191_v63, %v1829_v1 }
 0xb18   : > { %v1843_v4 = vadd.f32 %v2192_v2, %v1836_v3 }
 0xb1a   : > { %2358 = vmatmul.mubr.msk.f32.vlgmr.msra.gmra.mxu0 %vm605_vm1, %v1843_v4 }
 0xbda   : > { %v1924_v15 = vpop.f32.mrf.mxu0 }
 0xbdb   : > { %v1925_v16 = vadd.f32 %v2193_v14, %v1924_v15 }
 0xbdc   : > { %v2359_v17 = vpop.f32.mrf.mxu0 }
 0xbdd   : > { %v1929_v20 = vmul.f32 0.70710677, %v1925_v16  ;;  %v1928_v22 = vmul.f32 0.5, %v1925_v16 }
 0xbdf   : > { %2471 = verf.f32 %v1929_v20 }
 0xbec   : > { %v2472_v21 = vpop.eup %2471 }
 0xbed   : > { %v1931_v18 = vadd.f32 1.0, %v2472_v21 }
 0xbef   : > { %v1932_v19 = vmul.f32 %v1931_v18, %v1928_v22 }
 0xbf1   : > { %2377 = vmatmul.mubr.msk.f32.vlgmr.msra.gmra.mxu1 %vm1948_vm4, %v1932_v19 }
 0xcb1   : > { %v2018_v23 = vpop.f32.mrf.mxu1 }
 0xcb2   : > { %v2019_v25 = vadd.f32 %v2195_v0, %v2018_v23 }
 0xcb3   : > { %v2378_v26 = vpop.f32.mrf.mxu1 }
 0xcb4   : > { %v2022_v27 = vadd.f32 %v2019_v25, %v1843_v4 }
 0xcb6   : > { %v2025_v28 = vsel %vm605_vm1, %v2022_v27, 0.0 }
 0xcb7   : > { %2026 = vadd.xlane.f32.xlu0 %v2025_v28 }
 0xd40   : > { %v2027_v31 = vpop.xlane.xlu0 %2026 }
 0xd41   : > { %v2028_v32 = vmul.f32 0.03125, %v2027_v31 }
 0xd43   : > { %v2029_v33 = vsub.f32 %v2022_v27, %v2028_v32 }
 0xd45   : > { %v2030_v34 = vmul.f32 %v2029_v33, %v2029_v33 }
 0xd47   : > { %v2031_v35 = vsel %vm605_vm1, %v2030_v34, 0.0 }
 0xd48   : > { %2032 = vadd.xlane.f32.xlu0 %v2031_v35 }
 0xdd1   : > { %v2033_v36 = vpop.xlane.xlu0 %2032 }
 0xdd2   : > { %v2034_v37 = vmul.f32 0.03125, %v2033_v36 }
 0xdd4   : > { %v2035_v29 = vadd.f32 1e-05, %v2034_v37 }
 0xdd6   : > { %2473 = vrsqrt.f32 %v2035_v29 }
 0xde3   : > { %v2474_v30 = vpop.eup %2473 }
 0xde4   : > { %v2037_v39 = vmul.f32 %v2474_v30, %v2029_v33 }
 0xde6   : > { %v2044_v41 = vmul.f32 %v2197_v38, %v2037_v39 }
 0xde8   : > { %v2051_v42 = vadd.f32 %v2198_v40, %v2044_v41 }
 0xdea   : > { %2052 = vst.msk [vmem:[%s592_s18] sm:$0xff] %vm605_vm1, %v2051_v42 }
 0xdeb   : > { %2568 = shalt.err (!%p2565_p9)
}
 0xdec   : > { %s2569_s27 = scalar_lea.hbm %s2065_s19, 128  ;;  %s2573_s16 = scalar_lea.hbm %s3198_s15, 256 }
 0xded   : > { %p2570_p13 = scmp.ne.s32.totalorder %s2065_s19, %s2569_s27  ;;  %p2574_p4 = scmp.lt.s32.totalorder %s2065_s19, %s3198_s15 }
 0xdee   : > { %p2575_p8 = scmp.lt.s32.totalorder %s2573_s16, %s2569_s27 }
 0xdef   : > { %p2571_p5 = pnand %p2570_p13, %p3199_p0 }
 0xdf0   : > { %p2576_p3 = por %p2575_p8, %p2574_p4 }
 0xdf1   : > { %p2572_p10 = pneg %p2571_p5 }
 0xdf3   : > { %p2577_p11 = pnand %p2576_p3, %p2572_p10 }
 0xdf5   : > { %2580 = shalt.err (!%p2577_p11)
}
 0xdf6   : > { %2389 = dma.vmem_to_hbm [thread:$0]  (%p3199_p0), %s2068_s24, 128, %s2065_s19, %s2054_s23  }
 0xdf7 PF: > { %s3200_s22 = sld [smem:[#allocation12_spill]] }
 0xdf8   : > { %s3201_s29 = sld [smem:[#allocation15_spill]] }
 0xdf9   : > { %s3202_s1 = sld [smem:[#allocation14_spill]] }
 0xdfd   : > { %s2079_s21 = sand.u32 1, %s3200_s22  }
 0xdfe   : > { %p3203_p1 = scmp.ne.s32.totalorder %s3201_s29, 0  ;;  %s2080_s28 = scalar_lea.sflag [#allocation4], %s2079_s21 }
 0xdff   : > { %p3204_p2 = scmp.ge.s32.totalorder %s3202_s1, 2 }
 0xe01   : > { %p2403_p6 = pnand %p3204_p2, %p3203_p1 }
 0xe03   : > { %p2404_p12 = pneg %p2403_p6 }
 0xe05   : > { %2606 = dma.done.wait (%p2404_p12), %s2080_s28, 128  }
 0xe06   : > { %2608 = vsyncadd (%p2404_p12), %s2080_s28, 4294967168  ;;  %s3205_s27 = sld [smem:[#allocation16_spill]]  ;;  %s3208_s24 = smov %s2615_s25 }
 0xe07   : > { %s3206_s20 = sld [smem:[#allocation13_spill]] }
 0xe08   : > { %s3207_s26 = sld [smem:[#allocation17_spill]] }
 0xe0c   : > { %p31_p7 = scmp.ge.s32.totalorder %s3205_s27, 4  }
 0xe0d   : > { %s3209_s25 = smov %s3206_s20 }
 0xe0e   :  { %33 = sbr.rel (!%p31_p7) target bundleno = 14 (0xe), region = 141 }
 0xe13   :  { %2085 = vsyncpa [#allocation3], 1 }
 0xe14   :  { %2087 = vsyncpa [#allocation3 + $0x1], 1 }
 0xe15   :  { %2088 = vsyncpa [#allocation6], 1 }
 0xe16   :  { %2089 = vsyncpa [#allocation4], 1 }
 0xe17   :  { %2091 = vsyncpa [#allocation4 + $0x1], 1 }

</bundles_post_ra>
